<compile_context>
chip_gen: v6e
topology: v6e:2x2x1
jax: 0.10.0
libtpu: 0.0.40
codegen_flags: <defaults>
</compile_context>

<pallas_src>
import functools

import jax
import jax.numpy as jnp
from jax.experimental import pallas as pl
from jax.experimental.pallas import tpu as pltpu


def _round_up(x, n):
    return ((x + n - 1) // n) * n


def _cdiv(a, b):
    return -(-a // b)


def actor_kernel(states_ref,   # (TB, state_dim + 1)        f32 (last col = epoch id)
                 w1_ref,       # (state_dim, hidden)        f32
                 b1_ref,       # (1, hidden)                f32
                 wcat_ref,     # (hidden, m * action_dim)   f32 (fused output bank)
                 bcat_ref,     # (1, m * action_dim)        f32
                 mask_ref,     # (1, action_dim)            f32 (0 = masked, nonzero = keep)
                 out_ref,      # (TB, action_dim)           f32
                 *, m, state_dim, action_dim):
    s = states_ref[...]                                                # single tile load
    x = s[:, :state_dim]                                               # (TB, state_dim)
    epoch = jnp.clip(jnp.round(s[:, state_dim:state_dim + 1]),
                     0.0, jnp.float32(m - 1))                          # (TB, 1)

    h = jnp.dot(x, w1_ref[...], preferred_element_type=jnp.float32) + b1_ref[...]
    h = jnp.maximum(h, 0.0)                                            # ReLU, (TB, hidden)

    # Single fused GEMM over all m output heads -> (TB, m * action_dim).
    wide = jnp.dot(h, wcat_ref[...], preferred_element_type=jnp.float32) + bcat_ref[...]

    # One-hot select of the per-row epoch head (epoch is rounded & clamped, so the
    # one-hot sums to exactly 1 and the result is bit-exact vs. a per-row gather).
    acc = jnp.zeros(out_ref.shape, jnp.float32)
    for e in range(m):                                                 # m is tiny; unrolled
        sel = (epoch == jnp.float32(e)).astype(jnp.float32)            # (TB, 1)
        acc = acc + sel * wide[:, e * action_dim:(e + 1) * action_dim]

    # Exact masked_fill semantics: replace (not add) masked logits with -1e9.
    out_ref[...] = jnp.where(mask_ref[...] == 0.0, jnp.float32(-1e9), acc)


def actor_forward(states, w1, b1, w_out, b_out, mask, *, J,
                  row_tile=2048, min_split_rows=1024):
    """states: (B, 2*J + 1) f32 (last column = epoch index). Returns (B, J, J) f32."""
    B = states.shape[0]
    state_dim = 2 * J
    hidden = w1.shape[1]
    action_dim = J * J
    m = w_out.shape[0]
    assert states.shape[1] == state_dim + 1

    states = states.astype(jnp.float32)

    # Fused output-layer bank: W_cat[h, e*A + a] = w_out[e, h, a]
    w_cat = jnp.transpose(w_out, (1, 0, 2)).reshape(hidden, m * action_dim)
    b_cat = b_out.reshape(1, m * action_dim).astype(jnp.float32)
    mask_f = mask.reshape(1, action_dim).astype(jnp.float32)

    # Row tiling: balanced, sublane-aligned tiles.  Force >= 2 grid steps when B is
    # large enough so v7x can shard the parallel batch axis across both TensorCores.
    n_steps = max(1, _cdiv(B, row_tile))
    if n_steps == 1 and B >= 2 * min_split_rows:
        n_steps = 2
    TB = _round_up(_cdiv(B, n_steps), 8)
    B_pad = n_steps * TB
    if B_pad != B:
        states = jnp.pad(states, ((0, B_pad - B), (0, 0)))   # pad rows only (epoch 0)

    kernel = functools.partial(actor_kernel, m=m, state_dim=state_dim,
                               action_dim=action_dim)

    grid_spec = pltpu.PrefetchScalarGridSpec(
        num_scalar_prefetch=0,
        grid=(n_steps,),
        in_specs=[
            pl.BlockSpec((TB, state_dim + 1), lambda b: (b, 0)),
            pl.BlockSpec((state_dim, hidden), lambda b: (0, 0)),
            pl.BlockSpec((1, hidden), lambda b: (0, 0)),
            pl.BlockSpec((hidden, m * action_dim), lambda b: (0, 0)),
            pl.BlockSpec((1, m * action_dim), lambda b: (0, 0)),
            pl.BlockSpec((1, action_dim), lambda b: (0, 0)),
        ],
        out_specs=pl.BlockSpec((TB, action_dim), lambda b: (b, 0)),
    )

    out_flat = pl.pallas_call(
        kernel,
        out_shape=jax.ShapeDtypeStruct((B_pad, action_dim), jnp.float32),
        grid_spec=grid_spec,
        compiler_params=pltpu.CompilerParams(
            dimension_semantics=("parallel",)),
    )(states, w1, b1, w_cat, b_cat, mask_f)

    return out_flat[:B].reshape(B, J, J)


def make_params(key, J, m, hidden=34):
    state_dim = 2 * J
    action_dim = J * J
    k1, k2, k3 = jax.random.split(key, 3)
    # fc1: kaiming_normal (fan_in = state_dim, gain = sqrt(2) for relu), bias = 0
    std = (2.0 / state_dim) ** 0.5
    w1 = std * jax.random.normal(k1, (state_dim, hidden), dtype=jnp.float32)
    b1 = jnp.zeros((1, hidden), dtype=jnp.float32)
    # output layers: default PyTorch Linear init ~ U(-1/sqrt(hidden), 1/sqrt(hidden))
    bound = 1.0 / (hidden ** 0.5)
    w_out = jax.random.uniform(k2, (m, hidden, action_dim), dtype=jnp.float32,
                               minval=-bound, maxval=bound)
    b_out = jax.random.uniform(k3, (m, action_dim), dtype=jnp.float32,
                               minval=-bound, maxval=bound)
    return w1, b1, w_out, b_out


def reference_forward(states, w1, b1, w_out, b_out, mask, *, J):
    """Plain-JAX reference mirroring the PyTorch per-state loop + masked_fill."""
    m = w_out.shape[0]
    state_dim = 2 * J
    epoch_idx = jnp.clip(jnp.round(states[:, -1]), 0, m - 1).astype(jnp.int32)
    x = states[:, :state_dim]
    h = jnp.maximum(x @ w1 + b1, 0.0)                       # (B, hidden)
    w_sel = w_out[epoch_idx]                                # (B, hidden, J*J)
    b_sel = b_out[epoch_idx]                                # (B, J*J)
    logits = jnp.einsum('bh,bha->ba', h, w_sel) + b_sel
    logits = logits.reshape(-1, J, J)
    return jnp.where(mask[None] == 0, jnp.float32(-1e9), logits)


if __name__ == "__main__":
    J = 4              # num_pools
    m = 3              # num_epochs_per_day
    B = 2              # batch of states
    hidden = 34
    state_dim = 2 * J

    key = jax.random.PRNGKey(0)
    kp, ks, km, ke = jax.random.split(key, 4)

    w1, b1, w_out, b_out = make_params(kp, J, m, hidden)

    # mask: (J, J) int, some zeros
    mask = (jax.random.uniform(km, (J, J)) > 0.3).astype(jnp.int32)

    # states: (B, state_dim + 1); last column = epoch index in [0, m)
    feats = jax.random.normal(ks, (B, state_dim), dtype=jnp.float32)
    epochs = jnp.array([1, 2], dtype=jnp.float32).reshape(B, 1)
    states = jnp.concatenate([feats, epochs], axis=1)

    out = actor_forward(states, w1, b1, w_out, b_out, mask, J=J)
    out = jax.block_until_ready(out)
    ref = reference_forward(states, w1, b1, w_out, b_out, mask, J=J)
    assert out.shape == (B, J, J)
    assert jnp.allclose(out, ref, atol=1e-4, rtol=1e-4), "mismatch vs reference (B=2)"

    # Second check: exercise multi-step grid + row padding (B not a multiple of TB).
    B2 = 37
    feats2 = jax.random.normal(ks, (B2, state_dim), dtype=jnp.float32)
    epochs2 = jax.random.randint(ke, (B2, 1), 0, m).astype(jnp.float32)
    states2 = jnp.concatenate([feats2, epochs2], axis=1)
    out2 = actor_forward(states2, w1, b1, w_out, b_out, mask, J=J, row_tile=16)
    out2 = jax.block_until_ready(out2)
    ref2 = reference_forward(states2, w1, b1, w_out, b_out, mask, J=J)
    assert out2.shape == (B2, J, J)
    assert jnp.allclose(out2, ref2, atol=1e-4, rtol=1e-4), "mismatch vs reference (B=37)"

    print("KERNEL_OK")
</pallas_src>

<mosaic_0001>
module attributes {stable_mosaic.version = 11 : i64} {
  func.func @actor_kernel(%arg0: i32, %arg1: memref<8x9xf32, #tpu.memory_space<vmem>>, %arg2: memref<8x34xf32, #tpu.memory_space<vmem>>, %arg3: memref<1x34xf32, #tpu.memory_space<vmem>>, %arg4: memref<34x48xf32, #tpu.memory_space<vmem>>, %arg5: memref<1x48xf32, #tpu.memory_space<vmem>>, %arg6: memref<1x16xf32, #tpu.memory_space<vmem>>, %arg7: memref<8x16xf32, #tpu.memory_space<vmem>>) attributes {dimension_semantics = [#tpu.dimension_semantics<parallel>], iteration_bounds = array<i64: 1>, scalar_prefetch = 0 : i64, scratch_operands = 0 : i64, tpu.core_type = #tpu.core_type<tc>, window_params = [{transform_indices = @transform_0, window_bounds = array<i64: 8, 9>}, {pipeline_mode = #tpu.pipeline_mode<synchronous>, transform_indices = @transform_1, window_bounds = array<i64: 8, 34>}, {pipeline_mode = #tpu.pipeline_mode<synchronous>, transform_indices = @transform_2, window_bounds = array<i64: 1, 34>}, {pipeline_mode = #tpu.pipeline_mode<synchronous>, transform_indices = @transform_3, window_bounds = array<i64: 34, 48>}, {pipeline_mode = #tpu.pipeline_mode<synchronous>, transform_indices = @transform_4, window_bounds = array<i64: 1, 48>}, {pipeline_mode = #tpu.pipeline_mode<synchronous>, transform_indices = @transform_5, window_bounds = array<i64: 1, 16>}, {transform_indices = @transform_6, window_bounds = array<i64: 8, 16>}]} {
    %c0 = arith.constant 0 : index
    %c0_0 = arith.constant 0 : index
    %0 = vector.load %arg1[%c0, %c0_0] : memref<8x9xf32, #tpu.memory_space<vmem>>, vector<8x9xf32>
    %1 = vector.extract_strided_slice %0 {offsets = [0, 0], sizes = [8, 8], strides = [1, 1]} : vector<8x9xf32> to vector<8x8xf32>
    %2 = vector.extract_strided_slice %0 {offsets = [0, 8], sizes = [8, 1], strides = [1, 1]} : vector<8x9xf32> to vector<8x1xf32>
    %3 = math.roundeven %2 : vector<8x1xf32>
    %cst = arith.constant 0.000000e+00 : f32
    %cst_1 = arith.constant 2.000000e+00 : f32
    %4 = vector.broadcast %cst : f32 to vector<8x1xf32>
    %5 = arith.maximumf %4, %3 : vector<8x1xf32>
    %6 = vector.broadcast %cst_1 : f32 to vector<8x1xf32>
    %7 = arith.minimumf %6, %5 : vector<8x1xf32>
    %c0_2 = arith.constant 0 : index
    %c0_3 = arith.constant 0 : index
    %8 = vector.load %arg2[%c0_2, %c0_3] : memref<8x34xf32, #tpu.memory_space<vmem>>, vector<8x34xf32>
    %cst_4 = arith.constant dense<0.000000e+00> : vector<8x34xf32>
    %9 = tpu.matmul %1, %8, %cst_4 {dimension_numbers = #tpu.dot_dimension_numbers<[1], [0], [0], [1], [0, 0, 1, 1], [], []>} : vector<8x8xf32>, vector<8x34xf32>, vector<8x34xf32> -> vector<8x34xf32>
    %c0_5 = arith.constant 0 : index
    %c0_6 = arith.constant 0 : index
    %10 = vector.load %arg3[%c0_5, %c0_6] : memref<1x34xf32, #tpu.memory_space<vmem>>, vector<1x34xf32>
    %11 = vector.broadcast %10 : vector<1x34xf32> to vector<8x34xf32>
    %12 = arith.addf %9, %11 : vector<8x34xf32>
    %cst_7 = arith.constant 0.000000e+00 : f32
    %13 = vector.broadcast %cst_7 : f32 to vector<8x34xf32>
    %14 = arith.maximumf %12, %13 : vector<8x34xf32>
    %c0_8 = arith.constant 0 : index
    %c0_9 = arith.constant 0 : index
    %15 = vector.load %arg4[%c0_8, %c0_9] : memref<34x48xf32, #tpu.memory_space<vmem>>, vector<34x48xf32>
    %cst_10 = arith.constant dense<0.000000e+00> : vector<8x48xf32>
    %16 = tpu.matmul %14, %15, %cst_10 {dimension_numbers = #tpu.dot_dimension_numbers<[1], [0], [0], [1], [0, 0, 1, 1], [], []>} : vector<8x34xf32>, vector<34x48xf32>, vector<8x48xf32> -> vector<8x48xf32>
    %c0_11 = arith.constant 0 : index
    %c0_12 = arith.constant 0 : index
    %17 = vector.load %arg5[%c0_11, %c0_12] : memref<1x48xf32, #tpu.memory_space<vmem>>, vector<1x48xf32>
    %18 = vector.broadcast %17 : vector<1x48xf32> to vector<8x48xf32>
    %19 = arith.addf %16, %18 : vector<8x48xf32>
    %cst_13 = arith.constant 0.000000e+00 : f32
    %20 = vector.broadcast %cst_13 : f32 to vector<8x16xf32>
    %cst_14 = arith.constant 0.000000e+00 : f32
    %21 = vector.broadcast %cst_14 : f32 to vector<8x1xf32>
    %22 = arith.cmpf oeq, %7, %21 : vector<8x1xf32>
    %23 = arith.extui %22 : vector<8x1xi1> to vector<8x1xi32>
    %24 = arith.sitofp %23 : vector<8x1xi32> to vector<8x1xf32>
    %25 = vector.extract_strided_slice %19 {offsets = [0, 0], sizes = [8, 16], strides = [1, 1]} : vector<8x48xf32> to vector<8x16xf32>
    %26 = vector.broadcast %24 : vector<8x1xf32> to vector<8x16xf32>
    %27 = arith.mulf %26, %25 : vector<8x16xf32>
    %28 = arith.addf %20, %27 : vector<8x16xf32>
    %cst_15 = arith.constant 1.000000e+00 : f32
    %29 = vector.broadcast %cst_15 : f32 to vector<8x1xf32>
    %30 = arith.cmpf oeq, %7, %29 : vector<8x1xf32>
    %31 = arith.extui %30 : vector<8x1xi1> to vector<8x1xi32>
    %32 = arith.sitofp %31 : vector<8x1xi32> to vector<8x1xf32>
    %33 = vector.extract_strided_slice %19 {offsets = [0, 16], sizes = [8, 16], strides = [1, 1]} : vector<8x48xf32> to vector<8x16xf32>
    %34 = vector.broadcast %32 : vector<8x1xf32> to vector<8x16xf32>
    %35 = arith.mulf %34, %33 : vector<8x16xf32>
    %36 = arith.addf %28, %35 : vector<8x16xf32>
    %cst_16 = arith.constant 2.000000e+00 : f32
    %37 = vector.broadcast %cst_16 : f32 to vector<8x1xf32>
    %38 = arith.cmpf oeq, %7, %37 : vector<8x1xf32>
    %39 = arith.extui %38 : vector<8x1xi1> to vector<8x1xi32>
    %40 = arith.sitofp %39 : vector<8x1xi32> to vector<8x1xf32>
    %41 = vector.extract_strided_slice %19 {offsets = [0, 32], sizes = [8, 16], strides = [1, 1]} : vector<8x48xf32> to vector<8x16xf32>
    %42 = vector.broadcast %40 : vector<8x1xf32> to vector<8x16xf32>
    %43 = arith.mulf %42, %41 : vector<8x16xf32>
    %44 = arith.addf %36, %43 : vector<8x16xf32>
    %c0_17 = arith.constant 0 : index
    %c0_18 = arith.constant 0 : index
    %45 = vector.load %arg6[%c0_17, %c0_18] : memref<1x16xf32, #tpu.memory_space<vmem>>, vector<1x16xf32>
    %cst_19 = arith.constant 0.000000e+00 : f32
    %46 = vector.broadcast %cst_19 : f32 to vector<1x16xf32>
    %47 = arith.cmpf oeq, %45, %46 : vector<1x16xf32>
    %cst_20 = arith.constant -1.000000e+09 : f32
    %48 = vector.shape_cast %47 : vector<1x16xi1> to vector<1x16xi1>
    %49 = vector.broadcast %48 : vector<1x16xi1> to vector<8x16xi1>
    %50 = vector.broadcast %cst_20 : f32 to vector<8x16xf32>
    %51 = arith.select %49, %50, %44 : vector<8x16xi1>, vector<8x16xf32>
    %c0_21 = arith.constant 0 : index
    %c0_22 = arith.constant 0 : index
    %52 = vector.load %arg7[%c0_21, %c0_22] : memref<8x16xf32, #tpu.memory_space<vmem>>, vector<8x16xf32>
    tpu.vector_store %arg7[%c0_21, %c0_22], %51 {strides = array<i32>} : memref<8x16xf32, #tpu.memory_space<vmem>>, vector<8x16xf32>,
    return
  }
  func.func @transform_0(%arg0: i32) -> (i32, i32) {
    %c0_i32 = arith.constant 0 : i32
    %c0_i32_0 = arith.constant 0 : i32
    return %arg0, %c0_i32 : i32, i32
  }
  func.func @transform_1(%arg0: i32) -> (i32, i32) {
    %c0_i32 = arith.constant 0 : i32
    %c0_i32_0 = arith.constant 0 : i32
    %c0_i32_1 = arith.constant 0 : i32
    return %c0_i32, %c0_i32_0 : i32, i32
  }
  func.func @transform_2(%arg0: i32) -> (i32, i32) {
    %c0_i32 = arith.constant 0 : i32
    %c0_i32_0 = arith.constant 0 : i32
    %c0_i32_1 = arith.constant 0 : i32
    return %c0_i32, %c0_i32_0 : i32, i32
  }
  func.func @transform_3(%arg0: i32) -> (i32, i32) {
    %c0_i32 = arith.constant 0 : i32
    %c0_i32_0 = arith.constant 0 : i32
    %c0_i32_1 = arith.constant 0 : i32
    return %c0_i32, %c0_i32_0 : i32, i32
  }
  func.func @transform_4(%arg0: i32) -> (i32, i32) {
    %c0_i32 = arith.constant 0 : i32
    %c0_i32_0 = arith.constant 0 : i32
    %c0_i32_1 = arith.constant 0 : i32
    return %c0_i32, %c0_i32_0 : i32, i32
  }
  func.func @transform_5(%arg0: i32) -> (i32, i32) {
    %c0_i32 = arith.constant 0 : i32
    %c0_i32_0 = arith.constant 0 : i32
    %c0_i32_1 = arith.constant 0 : i32
    return %c0_i32, %c0_i32_0 : i32, i32
  }
  func.func @transform_6(%arg0: i32) -> (i32, i32) {
    %c0_i32 = arith.constant 0 : i32
    %c0_i32_0 = arith.constant 0 : i32
    return %arg0, %c0_i32 : i32, i32
  }
}

</mosaic_0001>

<bundles_post_ra>
// kernel: tpu_custom_call.1
= control target key start
LH: loop header
LB: loop body
LE: loop exit
PB: predicated region body
PF: predicated region fallthrough
CT: control target
= control target key end

     0   :  { %11 = vsyncpa [#allocation3], 0  ;;  %s513_s0 = inlined_call_operand.hbm [shape: f32[8,9], index: 0, kind: input, shape index: {}]   ;;  %s514_s1 = inlined_call_operand.hbm [shape: f32[8,34], index: 1, kind: input, shape index: {}]   ;;  %s515_s2 = inlined_call_operand.vmem [shape: f32[1,34], index: 2, kind: input, shape index: {}]   ;;  %s516_s3 = inlined_call_operand.hbm [shape: f32[34,48], index: 3, kind: input, shape index: {}]   ;;  %s517_s4 = inlined_call_operand.vmem [shape: f32[1,48], index: 4, kind: input, shape index: {}]   ;;  %s518_s5 = inlined_call_operand.vmem [shape: f32[1,16], index: 5, kind: input, shape index: {}]   ;;  %s519_s6 = inlined_call_operand.hbm [shape: f32[8,16], index: 6, kind: output, shape index: {}]  }
   0x1   :  { %12 = vsyncpa [#allocation6], 0 }
   0x2   :  { %13 = vsyncpa [#allocation4], 0  ;;  %s445_s21 = smov [#allocation5]   ;;  %s446_s23 = smov [#allocation2]  }
   0x3   :  { %s30_s22 = sshll.u32 %s445_s21, 4  ;;  %s20_s24 = sshll.u32 %s446_s23, 4  ;;  %s31_s22 = int_to_ptr.vmem [resolvable:$true] %s30_s22  ;;  %s21_s24 = int_to_ptr.vmem [resolvable:$true] %s20_s24 }
   0x4   :  { %s367_s25 = scalar_lea.vmem %s31_s22, 128  ;;  %p372_p1 = scmp.lt.s32.totalorder %s31_s22, %s31_s22 }
   0x5   :  { %p368_p0 = scmp.ne.s32.totalorder %s31_s22, %s367_s25  ;;  %p373_p2 = scmp.lt.s32.totalorder %s367_s25, %s367_s25 }
   0x7   :  { %p374_p3 = por %p373_p2, %p372_p1 }
   0x9   :  { %p375_p4 = pnand %p374_p3, %p368_p0 }
   0xb   :  { %378 = shalt.err (!%p375_p4)
}
   0xc   :  { %33 = dma.hbm_to_vmem [thread:$0]  %s514_s1, 128, %s31_s22, [#allocation6]  }
   0xd   :  { %s387_s28 = scalar_lea.vmem %s21_s24, 128  ;;  %p392_p6 = scmp.lt.s32.totalorder %s21_s24, %s21_s24 }
   0xe   :  { %p388_p5 = scmp.ne.s32.totalorder %s21_s24, %s387_s28  ;;  %p393_p7 = scmp.lt.s32.totalorder %s387_s28, %s387_s28 }
  0x10   :  { %p394_p8 = por %p393_p7, %p392_p6 }
  0x12   :  { %p395_p9 = pnand %p394_p8, %p388_p5 }
  0x14   :  { %398 = shalt.err (!%p395_p9)
}
  0x15   :  { %23 = dma.hbm_to_vmem [thread:$0]  %s513_s0, 128, %s21_s24, [#allocation3]  }
  0x16   :  { %s447_s7 = smov [#allocation7]  }
  0x17   :  { %s41_s8 = sshll.u32 %s447_s7, 4  ;;  %s42_s8 = int_to_ptr.vmem [resolvable:$true] %s41_s8 }
  0x18   :  { %s407_s9 = scalar_lea.vmem %s42_s8, 640  ;;  %p412_p11 = scmp.lt.s32.totalorder %s42_s8, %s42_s8 }
  0x19   :  { %p408_p10 = scmp.ne.s32.totalorder %s42_s8, %s407_s9  ;;  %p413_p12 = scmp.lt.s32.totalorder %s407_s9, %s407_s9 }
  0x1b   :  { %p414_p13 = por %p413_p12, %p412_p11 }
  0x1d   :  { %p415_p0 = pnand %p414_p13, %p408_p10 }
  0x1f   :  { %418 = shalt.err (!%p415_p0)
}
  0x20   :  { %s448_s1 = smov 128   ;;  %s449_s10 = smov 8  }
  0x21   :  { %47 = dma.hbm_to_vmem [thread:$0]  %s516_s3, 640, %s42_s8, [#allocation6], %s448_s1, %s448_s1, %s449_s10  }
  0x22   :  { %439 = dma.done.wait [#allocation3], 128  }
  0x23   :  { %440 = vsyncadd [#allocation3], 4294967168 }
  0x24   :  { %441 = dma.done.wait [#allocation6], 768  }
  0x25   :  { %442 = vsyncadd [#allocation6], 4294966528  ;;  %v450_v0 = vmov 0.0   ;;  %vm451_vm0 = vmmov 0   ;;  %vm164_vm1 = vcmask 1041408   ;;  %vm73_vm2 = vcmask 64512  }
  0x26   :  { %319 = vmatprep.subr.mxu0 %v450_v0  ;;  %321 = vmatprep.mubr.msk.f32.mxu0 %vm451_vm0, %v450_v0  ;;  %v65_v1 = vld [vmem:[#allocation5] sm:$0xff]  ;;  %v61_v2 = vld [vmem:[#allocation2] sm:$0xff]  ;;  %v152_v3 = vld [vmem:[#allocation7 + $0x20] sm:$0x3]  ;;  %v452_v14 = vmov 8   ;;  %vm160_vm7 = vcmask 277504   ;;  %v279_v34 = vlaneseq }
  0x27   :  { %324 = vmatprep.subr.mxu1 %v450_v0  ;;  %334 = vmatprep.mubr.msk.f32.mxu1 %vm451_vm0, %v450_v0  ;;  %v151_v4 = vld [vmem:[#allocation7 + $0x18] sm:$0xff]  ;;  %v339_v5 = vcvt.f32.s32 %v61_v2  ;;  %v150_v7 = vld [vmem:[#allocation7 + $0x10] sm:$0xff]  ;;  %v342_v9 = vand.u32 2147483648, %v61_v2  ;;  %v149_v10 = vld [vmem:[#allocation7 + $0x8] sm:$0xff]  ;;  %v337_v12 = vand.u32 2147483647, %v61_v2 }
  0x28   :  { %320 = vmatpush3.msra.mxu0 %v65_v1  ;;  %325 = vmatpush3.msk.msra.mxu1 %vm164_vm1, %v152_v3  ;;  %v148_v11 = vld [vmem:[#allocation7] sm:$0xff]  ;;  %v303_v21 = vld [vmem:[%s515_s2] ss:$0 sm:$0xff]  ;;  %s453_s15 = smov 96   ;;  %s454_s2 = smov 112   ;;  %v280_v36 = vshrl.u32 %v279_v34, 7 }
  0x29   :  { %322 = vmatmul.mubr.msk.f32.vlgmr.msra.gmra.mxu0 %vm73_vm2, %v61_v2  ;;  %326 = vmatprep.subr.mxu1 %v450_v0  ;;  %v340_v6 = vcvt.s32.f32 %v339_v5  ;;  %vm338_vm3 = vcmp.lt.f32.partialorder %v337_v12, 8388608.0  ;;  %v305_v27 = vld [vmem:[%s517_s4] ss:$0 sm:$0xff]  ;;  %v455_v38 = vmov 0   ;;  %s456_s4 = smov [#allocation8]   ;;  %vm285_vm10 = vcmask 130048  }
  0x2a   :  { %327 = vmatpush3.msra.mxu1 %v151_v4  ;;  %357 = vset.pattern.permute.xlu0 %v452_v14  ;;  %v276_v35 = vld [vmem:[%s518_s5] sm:$0x1]  ;;  %v281_v37 = vsub.s32 0, %v280_v36  ;;  %s293_s18 = sshll.u32 %s456_s4, 4  ;;  %s294_s18 = int_to_ptr.vmem [resolvable:$true] %s293_s18 }
  0x2b   :  { %328 = vmatprep.subr.mxu1 %v450_v0  ;;  %v341_v8 = vand.u32 2147483647, %v340_v6  ;;  %358 = vset.pattern.permute.xlu1 %v452_v14  ;;  %vm277_vm8 = vcmp.eq.f32.partialorder %v276_v35, 0.0  ;;  %s419_s5 = scalar_lea.vmem %s294_s18, 128  ;;  %p424_p2 = scmp.lt.s32.totalorder %s294_s18, %s294_s18 }
  0x2c   :  { %329 = vmatpush3.msra.mxu1 %v150_v7  ;;  %v278_v39 = vsel %vm277_vm8, 1, %v455_v38  ;;  %p420_p1 = scmp.ne.s32.totalorder %s294_s18, %s419_s5  ;;  %p425_p3 = scmp.lt.s32.totalorder %s419_s5, %s419_s5 }
  0x2d   :  { %330 = vmatprep.subr.mxu1 %v450_v0  ;;  %v343_v13 = vor.u32 %v342_v9, %v341_v8  ;;  %v282_v41 = vrot.slane %v278_v39, %v281_v37 }
  0x2e   :  { %331 = vmatpush3.msra.mxu1 %v149_v10  ;;  %p426_p4 = por %p425_p3, %p424_p2 }
  0x2f   :  { %332 = vmatprep.subr.mxu1 %v450_v0  ;;  %v344_v15 = vsel %vm338_vm3, %v343_v13, %v61_v2  ;;  %vm283_vm9 = vcmp.eq.s32.totalorder %v282_v41, 1 }
  0x30   :  { %333 = vmatpush3.msra.mxu1 %v148_v11  ;;  %v63_v16 = vmax.f32 %v344_v15, 0.0  ;;  %p427_p5 = pnand %p426_p4, %p420_p1 }
  0x32   :  { %v64_v17 = vmin.f32 %v63_v16, 2.0 }
  0x34   :  { %vm248_vm4 = vcmp.eq.f32.partialorder %v64_v17, 1.0  ;;  %vm262_vm5 = vcmp.eq.f32.partialorder %v64_v17, 2.0  ;;  %vm238_vm6 = vcmp.eq.f32.partialorder %v64_v17, 0.0 }
  0x35   :  { %v309_v18 = vsel %vm248_vm4, 1.0, %v450_v0  ;;  %v308_v19 = vsel %vm238_vm6, 1.0, %v450_v0  ;;  %v310_v20 = vsel %vm262_vm5, 1.0, %v450_v0 }
  0x36   :  { %253 = vperm.xlu0 %357, %v309_v18   ;;  %243 = vperm.xlu1 %358, %v308_v19  }
  0x3a   :  { %267 = vperm.xlu0 %357, %v310_v20  }
  0xb1   :  { %v254_v26 = vpop.permute.xlu0 %253  ;;  %v244_v40 = vpop.permute.xlu1 %243 }
  0xb5   :  { %v268_v30 = vpop.permute.xlu0 %267 }
  0xe9   :  { %v143_v22 = vpop.f32.mrf.mxu0 }
  0xea   :  { %v144_v23 = vadd.f32 %v303_v21, %v143_v22 }
  0xeb   :  { %v323_v24 = vpop.f32.mrf.mxu0 }
  0xec   :  { %v147_v25 = vmax.f32 %v144_v23, 0.0 }
  0xee   :  { %335 = vmatmul.mubr.msk.f32.vlgmr.msra.gmra.mxu1 %vm160_vm7, %v147_v25 }
 0x1ae   :  { %v234_v28 = vpop.f32.mrf.mxu1 }
 0x1af   :  { %v235_v29 = vadd.f32 %v305_v27, %v234_v28 }
 0x1b0   :  { %v336_v31 = vpop.f32.mrf.mxu1 }
 0x1b1   :  { %v270_v32 = vmul.f32 %v268_v30, %v235_v29  ;;  %v256_v33 = vmul.f32 %v254_v26, %v235_v29  ;;  %v246_v42 = vmul.f32 %v244_v40, %v235_v29 }
 0x1b3   :  { %272 = vrot.lane.b32.xlu0 %v270_v32, %s453_s15  ;;  %258 = vrot.lane.b32.xlu1 %v256_v33, %s454_s2 }
 0x225   :  { %v259_v43 = vpop.permute.xlu1 %258  ;;  %v273_v45 = vpop.permute.xlu0 %272 }
 0x226   :  { %v261_v44 = vadd.f32 %v259_v43, %v246_v42 }
 0x228   :  { %v275_v46 = vadd.f32 %v273_v45, %v261_v44 }
 0x22a   :  { %v284_v47 = vsel %vm283_vm9, -1e+09, %v275_v46 }
 0x22b   :  { %286 = vst.msk [vmem:[#allocation8] sm:$0xff] %vm285_vm10, %v284_v47 }
 0x22c   :  { %430 = shalt.err (!%p427_p5)
}
 0x22d   :  { %296 = dma.vmem_to_hbm [thread:$0]  %s294_s18, 128, %s519_s6, [#allocation4]  }
 0x22e   :  { %443 = dma.done.wait [#allocation4], 128  }
 0x22f   :  { %444 = vsyncadd [#allocation4], 4294967168 }
 0x230   :  { %300 = vsyncpa [#allocation3], 1 }
 0x231   :  { %301 = vsyncpa [#allocation6], 1 }
 0x232   :  { %302 = vsyncpa [#allocation4], 1 }

</bundles_post_ra>
